<compile_context>
chip_gen: v5e
topology: v5e:2x2
jax: 0.10.0
libtpu: 0.0.40
codegen_flags: <defaults>
</compile_context>

<pallas_src>
import jax
import jax.numpy as jnp
from jax.experimental import pallas as pl
from jax.experimental.pallas import tpu as pltpu


def _mlp_kernel(x_ref, w1_ref, b1_ref, w2_ref, b2_ref, o_ref):
    # x_ref:  (TB, F)   streamed batch tile (natural HBM layout)
    # w1_ref: (F, H)    resident across tiles
    # b1_ref: (1, H)
    # w2_ref: (H, O)    resident across tiles
    # b2_ref: (1, O)
    # o_ref:  (TB, O)
    h = jnp.dot(x_ref[...], w1_ref[...], preferred_element_type=jnp.float32)
    h = jnp.maximum(h + b1_ref[...], 0.0)                                  # ReLU
    y = jnp.dot(h, w2_ref[...], preferred_element_type=jnp.float32) + b2_ref[...]
    o_ref[...] = y.astype(o_ref.dtype)


def post_branch_net(x, w1, b1, w2, b2, *, batch_tile=2048):
    """PostBranchNet forward. x: (batch, n, horizon).
    Weights stored as (in, out) = transpose of the PyTorch nn.Linear weight.
    Returns (batch, num_outputs)."""
    batch = x.shape[0]
    x_flat = x.reshape(batch, -1)              # nn.Flatten(): free, row-major
    in_features = x_flat.shape[1]
    hidden = w1.shape[1]
    num_outputs = w2.shape[1]

    # Pick the batch tile: as large as possible (amortize per-grid-step overhead)
    # while keeping the double-buffered x block around <= 2 MiB of VMEM.
    row_bytes = in_features * x_flat.dtype.itemsize
    vmem_cap_rows = max(8, ((2 * 1024 * 1024) // max(row_bytes, 1)) // 8 * 8)
    tb = min(batch_tile, vmem_cap_rows)
    if batch <= tb:
        tb = batch                             # single full-array block, grid=(1,)
    grid = (pl.cdiv(batch, tb),)               # boundary tile masked by Pallas

    b1_r = b1.reshape(1, hidden)
    b2_r = b2.reshape(1, num_outputs)

    return pl.pallas_call(
        _mlp_kernel,
        out_shape=jax.ShapeDtypeStruct((batch, num_outputs), x.dtype),
        grid=grid,
        in_specs=[
            pl.BlockSpec((tb, in_features), lambda i: (i, 0)),       # x (streamed)
            pl.BlockSpec((in_features, hidden), lambda i: (0, 0)),   # w1 (resident)
            pl.BlockSpec((1, hidden), lambda i: (0, 0)),             # b1 (resident)
            pl.BlockSpec((hidden, num_outputs), lambda i: (0, 0)),   # w2 (resident)
            pl.BlockSpec((1, num_outputs), lambda i: (0, 0)),        # b2 (resident)
        ],
        out_specs=pl.BlockSpec((tb, num_outputs), lambda i: (i, 0)),
        compiler_params=pltpu.CompilerParams(
            # independent batch tiles -> shard across both TCs on v7x
            dimension_semantics=("parallel",),
        ),
    )(x_flat, w1, b1_r, w2, b2_r)


def init_params(key, n, horizon, hidden, num_outputs):
    """Deterministic synthetic init (shapes match the PyTorch module)."""
    in_features = n * horizon
    k1, k2, k3, k4 = jax.random.split(key, 4)
    # Stored as (in, out) = transpose of PyTorch nn.Linear weight (out, in).
    w1 = jax.random.normal(k1, (in_features, hidden), jnp.float32) * 0.1
    b1 = jax.random.normal(k2, (hidden,), jnp.float32) * 0.1
    w2 = jax.random.normal(k3, (hidden, num_outputs), jnp.float32) * 0.1
    b2 = jax.random.normal(k4, (num_outputs,), jnp.float32) * 0.1
    return w1, b1, w2, b2


def _ref_forward(x, w1, b1, w2, b2):
    x_flat = x.reshape(x.shape[0], -1)
    return jnp.maximum(x_flat @ w1 + b1, 0.0) @ w2 + b2


if __name__ == "__main__":
    # Small shapes consistent with the module: n channels x horizon timesteps.
    batch, n, horizon = 2, 4, 8
    hidden, num_outputs = 32, 8

    key = jax.random.PRNGKey(0)
    kx, kp = jax.random.split(key)
    x = jax.random.normal(kx, (batch, n, horizon), jnp.float32)
    w1, b1, w2, b2 = init_params(kp, n, horizon, hidden, num_outputs)

    out = jax.block_until_ready(post_branch_net(x, w1, b1, w2, b2))
    ref = _ref_forward(x, w1, b1, w2, b2)
    assert out.shape == (batch, num_outputs)
    assert jnp.allclose(out, ref, atol=1e-5, rtol=1e-5)

    # Single-block path with a batch that is not a multiple of 8.
    mid_batch = 600
    xm = jax.random.normal(jax.random.PRNGKey(1), (mid_batch, n, horizon), jnp.float32)
    out_m = jax.block_until_ready(post_branch_net(xm, w1, b1, w2, b2))
    ref_m = _ref_forward(xm, w1, b1, w2, b2)
    assert out_m.shape == (mid_batch, num_outputs)
    assert jnp.allclose(out_m, ref_m, atol=1e-5, rtol=1e-5)

    # Multi-tile path with a partial boundary tile (2500 = 2*1024 + 452), no padding copy.
    big_batch = 2500
    xb = jax.random.normal(jax.random.PRNGKey(2), (big_batch, n, horizon), jnp.float32)
    out_b = jax.block_until_ready(post_branch_net(xb, w1, b1, w2, b2, batch_tile=1024))
    ref_b = _ref_forward(xb, w1, b1, w2, b2)
    assert out_b.shape == (big_batch, num_outputs)
    assert jnp.allclose(out_b, ref_b, atol=1e-5, rtol=1e-5)

    print("KERNEL_OK")
</pallas_src>

<mosaic_0001>
module attributes {stable_mosaic.version = 11 : i64} {
  func.func @_mlp_kernel(%arg0: i32, %arg1: memref<2x32xf32, #tpu.memory_space<vmem>>, %arg2: memref<32x32xf32, #tpu.memory_space<vmem>>, %arg3: memref<1x32xf32, #tpu.memory_space<vmem>>, %arg4: memref<32x8xf32, #tpu.memory_space<vmem>>, %arg5: memref<1x8xf32, #tpu.memory_space<vmem>>, %arg6: memref<2x8xf32, #tpu.memory_space<vmem>>) attributes {dimension_semantics = [#tpu.dimension_semantics<parallel>], iteration_bounds = array<i64: 1>, scalar_prefetch = 0 : i64, scratch_operands = 0 : i64, tpu.core_type = #tpu.core_type<tc>, window_params = [{transform_indices = @transform_0, window_bounds = array<i64: 2, 32>}, {pipeline_mode = #tpu.pipeline_mode<synchronous>, transform_indices = @transform_1, window_bounds = array<i64: 32, 32>}, {pipeline_mode = #tpu.pipeline_mode<synchronous>, transform_indices = @transform_2, window_bounds = array<i64: 1, 32>}, {pipeline_mode = #tpu.pipeline_mode<synchronous>, transform_indices = @transform_3, window_bounds = array<i64: 32, 8>}, {pipeline_mode = #tpu.pipeline_mode<synchronous>, transform_indices = @transform_4, window_bounds = array<i64: 1, 8>}, {transform_indices = @transform_5, window_bounds = array<i64: 2, 8>}]} {
    %c0 = arith.constant 0 : index
    %c0_0 = arith.constant 0 : index
    %0 = vector.load %arg1[%c0, %c0_0] : memref<2x32xf32, #tpu.memory_space<vmem>>, vector<2x32xf32>
    %c0_1 = arith.constant 0 : index
    %c0_2 = arith.constant 0 : index
    %1 = vector.load %arg2[%c0_1, %c0_2] : memref<32x32xf32, #tpu.memory_space<vmem>>, vector<32x32xf32>
    %cst = arith.constant dense<0.000000e+00> : vector<2x32xf32>
    %2 = tpu.matmul %0, %1, %cst {dimension_numbers = #tpu.dot_dimension_numbers<[1], [0], [0], [1], [0, 0, 1, 1], [], []>} : vector<2x32xf32>, vector<32x32xf32>, vector<2x32xf32> -> vector<2x32xf32>
    %c0_3 = arith.constant 0 : index
    %c0_4 = arith.constant 0 : index
    %3 = vector.load %arg3[%c0_3, %c0_4] : memref<1x32xf32, #tpu.memory_space<vmem>>, vector<1x32xf32>
    %4 = vector.broadcast %3 : vector<1x32xf32> to vector<2x32xf32>
    %5 = arith.addf %2, %4 : vector<2x32xf32>
    %cst_5 = arith.constant 0.000000e+00 : f32
    %6 = vector.broadcast %cst_5 : f32 to vector<2x32xf32>
    %7 = arith.maximumf %5, %6 : vector<2x32xf32>
    %c0_6 = arith.constant 0 : index
    %c0_7 = arith.constant 0 : index
    %8 = vector.load %arg4[%c0_6, %c0_7] : memref<32x8xf32, #tpu.memory_space<vmem>>, vector<32x8xf32>
    %cst_8 = arith.constant dense<0.000000e+00> : vector<2x8xf32>
    %9 = tpu.matmul %7, %8, %cst_8 {dimension_numbers = #tpu.dot_dimension_numbers<[1], [0], [0], [1], [0, 0, 1, 1], [], []>} : vector<2x32xf32>, vector<32x8xf32>, vector<2x8xf32> -> vector<2x8xf32>
    %c0_9 = arith.constant 0 : index
    %c0_10 = arith.constant 0 : index
    %10 = vector.load %arg5[%c0_9, %c0_10] : memref<1x8xf32, #tpu.memory_space<vmem>>, vector<1x8xf32>
    %11 = vector.broadcast %10 : vector<1x8xf32> to vector<2x8xf32>
    %12 = arith.addf %9, %11 : vector<2x8xf32>
    %c0_11 = arith.constant 0 : index
    %c0_12 = arith.constant 0 : index
    %13 = vector.load %arg6[%c0_11, %c0_12] : memref<2x8xf32, #tpu.memory_space<vmem>>, vector<2x8xf32>
    tpu.vector_store %arg6[%c0_11, %c0_12], %12 {strides = array<i32>} : memref<2x8xf32, #tpu.memory_space<vmem>>, vector<2x8xf32>,
    return
  }
  func.func @transform_0(%arg0: i32) -> (i32, i32) {
    %c0_i32 = arith.constant 0 : i32
    %c0_i32_0 = arith.constant 0 : i32
    return %arg0, %c0_i32 : i32, i32
  }
  func.func @transform_1(%arg0: i32) -> (i32, i32) {
    %c0_i32 = arith.constant 0 : i32
    %c0_i32_0 = arith.constant 0 : i32
    %c0_i32_1 = arith.constant 0 : i32
    return %c0_i32, %c0_i32_0 : i32, i32
  }
  func.func @transform_2(%arg0: i32) -> (i32, i32) {
    %c0_i32 = arith.constant 0 : i32
    %c0_i32_0 = arith.constant 0 : i32
    %c0_i32_1 = arith.constant 0 : i32
    return %c0_i32, %c0_i32_0 : i32, i32
  }
  func.func @transform_3(%arg0: i32) -> (i32, i32) {
    %c0_i32 = arith.constant 0 : i32
    %c0_i32_0 = arith.constant 0 : i32
    %c0_i32_1 = arith.constant 0 : i32
    return %c0_i32, %c0_i32_0 : i32, i32
  }
  func.func @transform_4(%arg0: i32) -> (i32, i32) {
    %c0_i32 = arith.constant 0 : i32
    %c0_i32_0 = arith.constant 0 : i32
    %c0_i32_1 = arith.constant 0 : i32
    return %c0_i32, %c0_i32_0 : i32, i32
  }
  func.func @transform_5(%arg0: i32) -> (i32, i32) {
    %c0_i32 = arith.constant 0 : i32
    %c0_i32_0 = arith.constant 0 : i32
    return %arg0, %c0_i32 : i32, i32
  }
}

</mosaic_0001>

<bundles_post_ra>
// kernel: tpu_custom_call.1
= control target key start
LH: loop header
LB: loop body
LE: loop exit
PB: predicated region body
PF: predicated region fallthrough
CT: control target
= control target key end

     0   :  { %s202_s0 = inlined_call_operand.vmem [shape: f32[2,32], index: 0, kind: input, shape index: {}]   ;;  %s203_s1 = inlined_call_operand.vmem [shape: f32[32,32], index: 1, kind: input, shape index: {}]   ;;  %s204_s2 = inlined_call_operand.vmem [shape: f32[1,32], index: 2, kind: input, shape index: {}]   ;;  %s205_s3 = inlined_call_operand.vmem [shape: f32[32,8], index: 3, kind: input, shape index: {}]   ;;  %s206_s4 = inlined_call_operand.vmem [shape: f32[1,8], index: 4, kind: input, shape index: {}]   ;;  %s207_s5 = inlined_call_operand.hbm [shape: f32[2,8], index: 5, kind: output, shape index: {}]  }
   0x1   :  { %v25_v0 = vld [vmem:[%s203_s1 + $0x18] sm:$0xff]  ;;  %v24_v1 = vld [vmem:[%s203_s1 + $0x10] sm:$0xff]  ;;  %v23_v3 = vld [vmem:[%s203_s1 + $0x8] sm:$0xff] }
   0x2   :  { %46 = vmatpush.msra.mxu0 %v25_v0  ;;  %v58_v2 = vld [vmem:[%s205_s3 + $0x18] sm:$0xff] }
   0x3   :  { %78 = vmatpush.msra.mxu1 %v58_v2 }
   0x4   :  { %47 = vmatpush.msra.mxu0 %v24_v1 }
   0x5   :  { %10 = vsyncpa [#allocation3], 0  ;;  %v22_v4 = vld [vmem:[%s203_s1] sm:$0xff]  ;;  %vm30_vm0 = vcmask 261120   ;;  %v57_v6 = vld [vmem:[%s205_s3 + $0x10] sm:$0xff]  ;;  %s135_s13 = smov [#allocation2]  }
   0x6   :  { %48 = vmatpush.msra.mxu0 %v23_v3  ;;  %v21_v5 = vld [vmem:[%s202_s0] sm:$0x3]  ;;  %79 = vmatpush.msra.mxu1 %v57_v6  ;;  %v56_v7 = vld [vmem:[%s205_s3 + $0x8] sm:$0xff]  ;;  %s93_s14 = sshll.u32 %s135_s13, 4  ;;  %s95_s17 = sshll.u32 %s207_s5, 4  ;;  %vm86_vm1 = vcmask 58368   ;;  %s94_s14 = int_to_ptr.vmem [resolvable:$true] %s93_s14  ;;  %s96_s17 = int_to_ptr.hbm [resolvable:$true] %s95_s17 }
   0x7   :  { %v55_v8 = vld [vmem:[%s205_s3] sm:$0xff] }
   0x8   :  { %49 = vmatpush.msra.mxu0 %v22_v4  ;;  %80 = vmatpush.msra.mxu1 %v56_v7  ;;  %v107_v9 = vld [vmem:[%s204_s2] ss:$0 sm:$0xff] }
   0x9   :  { %104 = vmatmul.msk.f32.vlgmr.msra.gmra.mxu0 %vm30_vm0, %v21_v5  ;;  %v108_v13 = vld [vmem:[%s206_s4] ss:$0 sm:$0xff] }
   0xa   :  { %81 = vmatpush.msra.mxu1 %v55_v8 }
  0x86   :  { %v51_v10 = vpop.f32.mrf.mxu0 }
  0x87   :  { %v52_v11 = vadd.f32 %v107_v9, %v51_v10 }
  0x89   :  { %v54_v12 = vmax.f32 %v52_v11, 0.0 }
  0x8b   :  { %105 = vmatmul.msk.f32.vlgmr.msra.gmra.mxu1 %vm30_vm0, %v54_v12 }
 0x108   :  { %v83_v14 = vpop.f32.mrf.mxu1 }
 0x109   :  { %v84_v15 = vadd.f32 %v108_v13, %v83_v14 }
 0x10b   :  { %87 = vst.msk [vmem:[#allocation2] sm:$0x3] %vm86_vm1, %v84_v15 }
 0x10c   :  { %98 = dma.vmem_to_hbm [thread:$0]  %s94_s14, 32, %s96_s17, [#allocation3]  }
 0x10d   :  { %133 = dma.done.wait [#allocation3], 32  }
 0x10e   :  { %134 = vsyncadd [#allocation3], 4294967264 }
 0x10f   :  { %103 = vsyncpa [#allocation3], 1 }

</bundles_post_ra>
